<compile_context>
chip_gen: v7x
topology: tpu7x:2x2x1
jax: 0.10.0
libtpu: 0.0.40
codegen_flags: <defaults>
</compile_context>

<pallas_src>
import functools

import jax
import jax.numpy as jnp
from jax.experimental import pallas as pl
from jax.experimental.pallas import tpu as pltpu


def _mlp_kernel(xt_ref, w1_ref, b1_ref, w2_ref, b2_ref, w3_ref, b3_ref, o_ref):
    # xt_ref: (8, TILE_N) -- features on sublanes, batch on lanes.
    xt = xt_ref[...]

    # (out, in) @ (in, TILE_N) -> (out, TILE_N); RHS is lane-dense so the
    # sigmoid (EUP) and bias add (VPU) run on full 128-lane vregs.
    h1 = jax.nn.sigmoid(
        jnp.dot(w1_ref[...], xt, preferred_element_type=jnp.float32) + b1_ref[...])
    h2 = jax.nn.sigmoid(
        jnp.dot(w2_ref[...], h1, preferred_element_type=jnp.float32) + b2_ref[...])
    h3 = jax.nn.sigmoid(
        jnp.dot(w3_ref[...], h2, preferred_element_type=jnp.float32) + b3_ref[...])

    # Lane-dense (1, TILE_N) store -> unmasked vst.
    o_ref[...] = h3.astype(o_ref.dtype)


def _round_up(x, m):
    return ((x + m - 1) // m) * m


@functools.partial(jax.jit, static_argnames=("tile_n",))
def mlp_forward(x, params, tile_n=1024):
    """x: (N, 8) float32 -> (N, 1) float32 (same semantics as the PyTorch model)."""
    n = x.shape[0]
    # Lane-aligned batch tile; >=512 amortizes per-grid-step overhead, but do
    # not over-pad tiny demo batches.
    tile_n = min(tile_n, _round_up(n, 128))
    n_pad = _round_up(n, tile_n)

    # Batch-on-lanes layout in HBM: (8, N_pad). The same transpose that makes
    # the compute lane-dense also makes the x DMA a wide contiguous slab.
    xt = jnp.pad(x, ((0, n_pad - n), (0, 0))).T  # (8, N_pad)

    w1, b1 = params["w1"], params["b1"]   # (6, 8), (6, 1)
    w2, b2 = params["w2"], params["b2"]   # (4, 6), (4, 1)
    w3, b3 = params["w3"], params["b3"]   # (1, 4), (1, 1)

    const = lambda i: (0, 0)  # same block every grid step -> weights stay resident

    out_t = pl.pallas_call(
        _mlp_kernel,
        out_shape=jax.ShapeDtypeStruct((1, n_pad), jnp.float32),
        grid_spec=pltpu.PrefetchScalarGridSpec(
            num_scalar_prefetch=0,
            grid=(n_pad // tile_n,),
            in_specs=[
                pl.BlockSpec((8, tile_n), lambda i: (0, i)),   # x tile (pipelined)
                pl.BlockSpec(w1.shape, const),
                pl.BlockSpec(b1.shape, const),
                pl.BlockSpec(w2.shape, const),
                pl.BlockSpec(b2.shape, const),
                pl.BlockSpec(w3.shape, const),
                pl.BlockSpec(b3.shape, const),
            ],
            out_specs=pl.BlockSpec((1, tile_n), lambda i: (0, i)),
        ),
        compiler_params=pltpu.CompilerParams(
            dimension_semantics=("parallel",),   # v7x: shard batch over both TCs
        ),
    )(xt, w1, b1, w2, b2, w3, b3)

    return out_t.T[:n]  # (N, 1)


def init_params():
    """Deterministic init mirroring PyTorch nn.Linear shapes.

    Weights are kept in PyTorch's native (out, in) layout; biases as (out, 1)
    so they broadcast along the lane (batch) axis inside the kernel.
    """
    key = jax.random.PRNGKey(42)
    ks = jax.random.split(key, 6)

    def uniform_init(k, shape, fan_in):
        bound = 1.0 / jnp.sqrt(fan_in)
        return jax.random.uniform(k, shape, jnp.float32, -bound, bound)

    return {
        "w1": uniform_init(ks[0], (6, 8), 8.0),
        "b1": uniform_init(ks[1], (6, 1), 8.0),
        "w2": uniform_init(ks[2], (4, 6), 6.0),
        "b2": uniform_init(ks[3], (4, 1), 6.0),
        "w3": uniform_init(ks[4], (1, 4), 4.0),
        "b3": uniform_init(ks[5], (1, 1), 4.0),
    }


def reference_forward(x, p):
    h1 = jax.nn.sigmoid(x @ p["w1"].T + p["b1"].T)
    h2 = jax.nn.sigmoid(h1 @ p["w2"].T + p["b2"].T)
    return jax.nn.sigmoid(h2 @ p["w3"].T + p["b3"].T)


if __name__ == "__main__":
    params = init_params()

    # Small batch consistent with the module's 8-feature input.
    x_small = jax.random.normal(jax.random.PRNGKey(0), (16, 8), dtype=jnp.float32)
    out_small = jax.block_until_ready(mlp_forward(x_small, params))
    ref_small = reference_forward(x_small, params)
    assert out_small.shape == (16, 1), out_small.shape
    assert jnp.allclose(out_small, ref_small, atol=1e-5, rtol=1e-5), "mismatch (small batch)"

    # Larger, non-tile-multiple batch to exercise the grid + padding path.
    x_big = jax.random.normal(jax.random.PRNGKey(0), (2500, 8), dtype=jnp.float32)
    out_big = jax.block_until_ready(mlp_forward(x_big, params))
    ref_big = reference_forward(x_big, params)
    assert out_big.shape == (2500, 1), out_big.shape
    assert jnp.allclose(out_big, ref_big, atol=1e-5, rtol=1e-5), "mismatch (gridded batch)"

    print("KERNEL_OK")
</pallas_src>

<mosaic_0001>
module attributes {stable_mosaic.version = 11 : i64} {
  func.func @_mlp_kernel(%arg0: i32, %arg1: memref<8x128xf32, #tpu.memory_space<vmem>>, %arg2: memref<6x8xf32, #tpu.memory_space<vmem>>, %arg3: memref<6x1xf32, #tpu.memory_space<vmem>>, %arg4: memref<4x6xf32, #tpu.memory_space<vmem>>, %arg5: memref<4x1xf32, #tpu.memory_space<vmem>>, %arg6: memref<1x4xf32, #tpu.memory_space<vmem>>, %arg7: memref<1x1xf32, #tpu.memory_space<vmem>>, %arg8: memref<1x128xf32, #tpu.memory_space<vmem>>) attributes {dimension_semantics = [#tpu.dimension_semantics<parallel>], iteration_bounds = array<i64: 1>, scalar_prefetch = 0 : i64, scratch_operands = 0 : i64, tpu.core_type = #tpu.core_type<tc>, window_params = [{transform_indices = @transform_0, window_bounds = array<i64: 8, 128>}, {pipeline_mode = #tpu.pipeline_mode<synchronous>, transform_indices = @transform_1, window_bounds = array<i64: 6, 8>}, {pipeline_mode = #tpu.pipeline_mode<synchronous>, transform_indices = @transform_2, window_bounds = array<i64: 6, 1>}, {pipeline_mode = #tpu.pipeline_mode<synchronous>, transform_indices = @transform_3, window_bounds = array<i64: 4, 6>}, {pipeline_mode = #tpu.pipeline_mode<synchronous>, transform_indices = @transform_4, window_bounds = array<i64: 4, 1>}, {pipeline_mode = #tpu.pipeline_mode<synchronous>, transform_indices = @transform_5, window_bounds = array<i64: 1, 4>}, {pipeline_mode = #tpu.pipeline_mode<synchronous>, transform_indices = @transform_6, window_bounds = array<i64: 1, 1>}, {transform_indices = @transform_7, window_bounds = array<i64: 1, 128>}]} {
    %c0 = arith.constant 0 : index
    %c0_0 = arith.constant 0 : index
    %0 = vector.load %arg1[%c0, %c0_0] : memref<8x128xf32, #tpu.memory_space<vmem>>, vector<8x128xf32>
    %c0_1 = arith.constant 0 : index
    %c0_2 = arith.constant 0 : index
    %1 = vector.load %arg2[%c0_1, %c0_2] : memref<6x8xf32, #tpu.memory_space<vmem>>, vector<6x8xf32>
    %cst = arith.constant dense<0.000000e+00> : vector<6x128xf32>
    %2 = tpu.matmul %1, %0, %cst {dimension_numbers = #tpu.dot_dimension_numbers<[1], [0], [0], [1], [0, 0, 1, 1], [], []>} : vector<6x8xf32>, vector<8x128xf32>, vector<6x128xf32> -> vector<6x128xf32>
    %c0_3 = arith.constant 0 : index
    %c0_4 = arith.constant 0 : index
    %3 = vector.load %arg3[%c0_3, %c0_4] : memref<6x1xf32, #tpu.memory_space<vmem>>, vector<6x1xf32>
    %4 = vector.broadcast %3 : vector<6x1xf32> to vector<6x128xf32>
    %5 = arith.addf %2, %4 : vector<6x128xf32>
    %6 = arith.negf %5 : vector<6x128xf32>
    %7 = math.exp %6 : vector<6x128xf32>
    %cst_5 = arith.constant 1.000000e+00 : f32
    %8 = vector.broadcast %cst_5 : f32 to vector<6x128xf32>
    %9 = arith.addf %8, %7 : vector<6x128xf32>
    %10 = arith.divf %8, %9 : vector<6x128xf32>
    %c0_6 = arith.constant 0 : index
    %c0_7 = arith.constant 0 : index
    %11 = vector.load %arg4[%c0_6, %c0_7] : memref<4x6xf32, #tpu.memory_space<vmem>>, vector<4x6xf32>
    %cst_8 = arith.constant dense<0.000000e+00> : vector<4x128xf32>
    %12 = tpu.matmul %11, %10, %cst_8 {dimension_numbers = #tpu.dot_dimension_numbers<[1], [0], [0], [1], [0, 0, 1, 1], [], []>} : vector<4x6xf32>, vector<6x128xf32>, vector<4x128xf32> -> vector<4x128xf32>
    %c0_9 = arith.constant 0 : index
    %c0_10 = arith.constant 0 : index
    %13 = vector.load %arg5[%c0_9, %c0_10] : memref<4x1xf32, #tpu.memory_space<vmem>>, vector<4x1xf32>
    %14 = vector.broadcast %13 : vector<4x1xf32> to vector<4x128xf32>
    %15 = arith.addf %12, %14 : vector<4x128xf32>
    %16 = arith.negf %15 : vector<4x128xf32>
    %17 = math.exp %16 : vector<4x128xf32>
    %cst_11 = arith.constant 1.000000e+00 : f32
    %18 = vector.broadcast %cst_11 : f32 to vector<4x128xf32>
    %19 = arith.addf %18, %17 : vector<4x128xf32>
    %20 = arith.divf %18, %19 : vector<4x128xf32>
    %c0_12 = arith.constant 0 : index
    %c0_13 = arith.constant 0 : index
    %21 = vector.load %arg6[%c0_12, %c0_13] : memref<1x4xf32, #tpu.memory_space<vmem>>, vector<1x4xf32>
    %cst_14 = arith.constant dense<0.000000e+00> : vector<1x128xf32>
    %22 = tpu.matmul %21, %20, %cst_14 {dimension_numbers = #tpu.dot_dimension_numbers<[1], [0], [0], [1], [0, 0, 1, 1], [], []>} : vector<1x4xf32>, vector<4x128xf32>, vector<1x128xf32> -> vector<1x128xf32>
    %c0_15 = arith.constant 0 : index
    %c0_16 = arith.constant 0 : index
    %23 = vector.load %arg7[%c0_15, %c0_16] : memref<1x1xf32, #tpu.memory_space<vmem>>, vector<1x1xf32>
    %24 = vector.broadcast %23 : vector<1x1xf32> to vector<1x128xf32>
    %25 = arith.addf %22, %24 : vector<1x128xf32>
    %26 = arith.negf %25 : vector<1x128xf32>
    %27 = math.exp %26 : vector<1x128xf32>
    %cst_17 = arith.constant 1.000000e+00 : f32
    %28 = vector.broadcast %cst_17 : f32 to vector<1x128xf32>
    %29 = arith.addf %28, %27 : vector<1x128xf32>
    %30 = arith.divf %28, %29 : vector<1x128xf32>
    %c0_18 = arith.constant 0 : index
    %c0_19 = arith.constant 0 : index
    %31 = vector.load %arg8[%c0_18, %c0_19] : memref<1x128xf32, #tpu.memory_space<vmem>>, vector<1x128xf32>
    tpu.vector_store %arg8[%c0_18, %c0_19], %30 {strides = array<i32>} : memref<1x128xf32, #tpu.memory_space<vmem>>, vector<1x128xf32>,
    return
  }
  func.func @transform_0(%arg0: i32) -> (i32, i32) {
    %c0_i32 = arith.constant 0 : i32
    %c0_i32_0 = arith.constant 0 : i32
    return %c0_i32, %arg0 : i32, i32
  }
  func.func @transform_1(%arg0: i32) -> (i32, i32) {
    %c0_i32 = arith.constant 0 : i32
    %c0_i32_0 = arith.constant 0 : i32
    %c0_i32_1 = arith.constant 0 : i32
    return %c0_i32, %c0_i32_0 : i32, i32
  }
  func.func @transform_2(%arg0: i32) -> (i32, i32) {
    %c0_i32 = arith.constant 0 : i32
    %c0_i32_0 = arith.constant 0 : i32
    %c0_i32_1 = arith.constant 0 : i32
    return %c0_i32, %c0_i32_0 : i32, i32
  }
  func.func @transform_3(%arg0: i32) -> (i32, i32) {
    %c0_i32 = arith.constant 0 : i32
    %c0_i32_0 = arith.constant 0 : i32
    %c0_i32_1 = arith.constant 0 : i32
    return %c0_i32, %c0_i32_0 : i32, i32
  }
  func.func @transform_4(%arg0: i32) -> (i32, i32) {
    %c0_i32 = arith.constant 0 : i32
    %c0_i32_0 = arith.constant 0 : i32
    %c0_i32_1 = arith.constant 0 : i32
    return %c0_i32, %c0_i32_0 : i32, i32
  }
  func.func @transform_5(%arg0: i32) -> (i32, i32) {
    %c0_i32 = arith.constant 0 : i32
    %c0_i32_0 = arith.constant 0 : i32
    %c0_i32_1 = arith.constant 0 : i32
    return %c0_i32, %c0_i32_0 : i32, i32
  }
  func.func @transform_6(%arg0: i32) -> (i32, i32) {
    %c0_i32 = arith.constant 0 : i32
    %c0_i32_0 = arith.constant 0 : i32
    %c0_i32_1 = arith.constant 0 : i32
    return %c0_i32, %c0_i32_0 : i32, i32
  }
  func.func @transform_7(%arg0: i32) -> (i32, i32) {
    %c0_i32 = arith.constant 0 : i32
    %c0_i32_0 = arith.constant 0 : i32
    return %c0_i32, %arg0 : i32, i32
  }
}

</mosaic_0001>

<bundles_post_ra>
// kernel: mlp_forward.1
= control target key start
LH: loop header
LB: loop body
LE: loop exit
PB: predicated region body
PF: predicated region fallthrough
CT: control target
= control target key end

     0   :  { %vm36_vm0 = vcmask 64512   ;;  %v353_v0 = vmov 0.0   ;;  %vm354_vm1 = vmmov 0   ;;  %v355_v4 = vmov 0   ;;  %s420_s0 = inlined_call_operand.vmem [shape: f32[8,128], index: 0, kind: input, shape index: {}]   ;;  %s421_s1 = inlined_call_operand.vmem [shape: f32[6,8], index: 1, kind: input, shape index: {}]   ;;  %s422_s2 = inlined_call_operand.vmem [shape: f32[6,1], index: 2, kind: input, shape index: {}]   ;;  %s423_s4 = inlined_call_operand.vmem [shape: f32[4,1], index: 4, kind: input, shape index: {}]   ;;  %s424_s3 = inlined_call_operand.vmem [shape: f32[4,6], index: 3, kind: input, shape index: {}]   ;;  %s425_s6 = inlined_call_operand.<no memory space> [shape: f32[1,1], index: 6, kind: input, shape index: {}]   ;;  %s426_s5 = inlined_call_operand.vmem [shape: f32[1,4], index: 5, kind: input, shape index: {}]   ;;  %s427_s7 = inlined_call_operand.vmem [shape: f32[1,128], index: 7, kind: output, shape index: {}]  }
   0x1   :  { %321 = vmatprep.subr.mxu0 %v353_v0  ;;  %v28_v1 = vld [vmem:[%s420_s0] sm:$0xff]  ;;  %323 = vmatprep.mubr.msk.f32.mxu0 %vm354_vm1, %v353_v0  ;;  %vm127_vm2 = vcmask 1045504   ;;  %vm123_vm3 = vcmask 48128   ;;  %v12_v15 = vstv %s425_s6  ;;  %vm222_vm4 = vcmask 1043456  }
   0x2   :  { %v29_v2 = vld [vmem:[%s421_s1] sm:$0x3f]  ;;  %322 = vmatpush3.msra.mxu0 %v28_v1  ;;  %339 = vset.pattern.permute.xlu0 %v355_v4  ;;  %13 = vst [vmem:[#allocation2] sm:$0x1] %v12_v15  ;;  %vm218_vm5 = vcmask 31744   ;;  %v214_v26 = vlaneseq }
   0x3   :  { %v30_v3 = vld [vmem:[%s422_s2] sm:$0x3f]  ;;  %324 = vmatmul.mubr.msk.f32.vlgmr.msra.gmra.mrb[0].mxu0 %vm36_vm0, %v29_v2  ;;  %326 = vmatprep.subr.mxu1 %v353_v0 }
   0x4   :  { %33 = vperm.xlu0 %339, %v30_v3   ;;  %v117_v5 = vld [vmem:[%s423_s4] sm:$0xf]  ;;  %328 = vmatprep.mubr.msk.f32.mxu1 %vm354_vm1, %v353_v0  ;;  %v215_v27 = vshrl.u32 %v214_v26, 7 }
   0x5   :  { %331 = vmatprep.subr.mxu0 %v353_v0  ;;  %333 = vmatprep.mubr.msk.f32.mxu0 %vm354_vm1, %v353_v0  ;;  %v116_v13 = vld [vmem:[%s424_s3] sm:$0xf] }
   0x6   :  { %340 = vset.pattern.permute.xlu1 %v355_v4  ;;  %v207_v24 = vld [vmem:[%s426_s5] sm:$0x1]  ;;  %v216_v28 = vsub.s32 0, %v215_v27 }
   0x8   :  { %120 = vperm.xlu0 %339, %v117_v5  }
   0x9   :  { %v208_v16 = vld [vmem:[#allocation2] sm:$0x1] }
   0xa   :  { %211 = vperm.xlu1 %340, %v208_v16  }
  0x83   :  { %v34_v6 = vpop.permute.xlu0 %33 }
  0x87   :  { %v121_v17 = vpop.permute.xlu0 %120 }
  0x89   :  { %v212_v29 = vpop.permute.xlu1 %211 }
  0x8a   :  { %v217_v30 = vrot.slane %v212_v29, %v216_v28 }
  0xd6   :  { %v106_v7 = vpop.f32.mrb[0].mxu0 }
  0xd7   :  { %v107_v8 = vadd.f32 %v106_v7, %v34_v6  ;;  %v325_v9 = vpop.f32.mrb[1].mxu0 }
  0xd9   :  { %v308_v10 = vmul.f32 -1.442695, %v107_v8 }
  0xdb   :  { %341 = vpow2.f32 %v308_v10 }
  0xe5   :  { %v342_v11 = vpop.eup %341 }
  0xe6   :  { %v113_v12 = vadd.f32 1.0, %v342_v11 }
  0xe8   :  { %343 = vrcp.f32 %v113_v12 }
  0xf2   :  { %v344_v14 = vpop.eup %343 }
  0xf3   :  { %327 = vmatpush3.msk.msra.mxu1 %vm127_vm2, %v344_v14 }
  0xf4   :  { %329 = vmatmul.mubr.msk.f32.vlgmr.msra.gmra.mrb[0].mxu1 %vm123_vm3, %v116_v13 }
 0x1c7   :  { %v197_v18 = vpop.f32.mrb[0].mxu1 }
 0x1c8   :  { %v198_v19 = vadd.f32 %v197_v18, %v121_v17  ;;  %v330_v20 = vpop.f32.mrb[1].mxu1 }
 0x1ca   :  { %v311_v21 = vmul.f32 -1.442695, %v198_v19 }
 0x1cc   :  { %345 = vpow2.f32 %v311_v21 }
 0x1d6   :  { %v346_v22 = vpop.eup %345 }
 0x1d7   :  { %v204_v23 = vadd.f32 1.0, %v346_v22 }
 0x1d9   :  { %347 = vrcp.f32 %v204_v23 }
 0x1e3   :  { %v348_v25 = vpop.eup %347 }
 0x1e4   :  { %332 = vmatpush3.msk.msra.mxu0 %vm222_vm4, %v348_v25 }
 0x1e5   :  { %334 = vmatmul.mubr.msk.f32.vlgmr.msra.gmra.mrb[2].mxu0 %vm218_vm5, %v207_v24 }
 0x2b8   :  { %v292_v31 = vpop.f32.mrb[2].mxu0 }
 0x2b9   :  { %v293_v32 = vadd.f32 %v292_v31, %v217_v30  ;;  %v335_v33 = vpop.f32.mrb[3].mxu0 }
 0x2bb   :  { %v314_v34 = vmul.f32 -1.442695, %v293_v32 }
 0x2bd   :  { %349 = vpow2.f32 %v314_v34 }
 0x2c7   :  { %v350_v35 = vpop.eup %349 }
 0x2c8   :  { %v299_v36 = vadd.f32 1.0, %v350_v35 }
 0x2ca   :  { %351 = vrcp.f32 %v299_v36 }
 0x2d4   :  { %v352_v37 = vpop.eup %351 }
 0x2d5   :  { %302 = vst [vmem:[%s427_s7] sm:$0x1] %v352_v37 }

</bundles_post_ra>
